<compile_context>
chip_gen: v7x
topology: tpu7x:2x2x1
jax: 0.10.0
libtpu: 0.0.40
codegen_flags: <defaults>
</compile_context>

<pallas_src>
import jax
import jax.numpy as jnp
from jax.experimental import pallas as pl
from jax.experimental.pallas import tpu as pltpu


def _round_up(n: int, m: int) -> int:
    return ((n + m - 1) // m) * m


def _disc_kernel(x_ref, w1_ref, b1_ref, w2_ref, b2_ref, out_ref):
    """Fused MLP tile: sigmoid(relu(x @ W1 + b1) @ W2 + b2).

    x_ref:   (TB, F)   VMEM f32   (tiled over batch; cast to bf16 in-kernel)
    w1_ref:  (F, 64)   VMEM bf16  (resident across grid steps)
    b1_ref:  (1, 64)   VMEM f32
    w2_ref:  (64, 16)  VMEM bf16
    b2_ref:  (1, 16)   VMEM f32
    out_ref: (TB, 16)  VMEM f32   (narrow: only the real 16 features hit HBM)
    """
    # Cast hidden under the DMA / MXU work; bf16 is the native MXU input path.
    x = x_ref[...].astype(jnp.bfloat16)

    # Layer 1: Linear + ReLU (bf16 MXU, f32 accumulation).
    h = jnp.dot(x, w1_ref[...], preferred_element_type=jnp.float32)
    h = jnp.maximum(h + b1_ref[...], 0.0).astype(jnp.bfloat16)

    # Layer 2: Linear + Sigmoid (exact; only 16 output lanes -> tiny EUP cost).
    z = jnp.dot(h, w2_ref[...], preferred_element_type=jnp.float32) + b2_ref[...]
    out_ref[...] = (1.0 / (1.0 + jnp.exp(-z))).astype(out_ref.dtype)


def discriminator_forward(x, w1, b1, w2, b2, *, block_b: int = 2048):
    """x: (B, F); w1: (F, 64); b1: (1, 64); w2: (64, 16); b2: (1, 16) -> (B, 16) f32."""
    B, F = x.shape
    H1 = w1.shape[1]
    H2 = w2.shape[1]

    # --- Batch tile selection -------------------------------------------------
    TB = min(block_b, B)
    # Ensure >= 2 grid steps when possible so v7x megacore can split the batch
    # across both TensorCores (no-op on single-TC v5e/v6e).
    if B >= 16 and pl.cdiv(B, TB) < 2:
        TB = pl.cdiv(B, 2)
    # Sublane-align the tile unless it covers the full batch (then block == array).
    if TB != B:
        TB = _round_up(TB, 8)
    grid = (pl.cdiv(B, TB),)

    # --- Small one-time weight prep (no pass over the big x array) -------------
    w1b = w1.astype(jnp.bfloat16)
    w2b = w2.astype(jnp.bfloat16)
    b1f = b1.reshape(1, H1).astype(jnp.float32)
    b2f = b2.reshape(1, H2).astype(jnp.float32)
    xf = x.astype(jnp.float32)

    cost = pl.CostEstimate(
        flops=2 * B * (F * H1 + H1 * H2),
        transcendentals=B * H2,
        bytes_accessed=(B * F * 4 + w1b.size * 2 + w2b.size * 2
                        + b1f.size * 4 + b2f.size * 4 + B * H2 * 4),
    )

    out = pl.pallas_call(
        _disc_kernel,
        out_shape=jax.ShapeDtypeStruct((B, H2), jnp.float32),
        grid_spec=pl.GridSpec(
            grid=grid,
            in_specs=[
                pl.BlockSpec((TB, F), lambda i: (i, 0)),   # x: tiled over batch
                pl.BlockSpec((F, H1), lambda i: (0, 0)),   # weights: VMEM-resident
                pl.BlockSpec((1, H1), lambda i: (0, 0)),
                pl.BlockSpec((H1, H2), lambda i: (0, 0)),
                pl.BlockSpec((1, H2), lambda i: (0, 0)),
            ],
            out_specs=pl.BlockSpec((TB, H2), lambda i: (i, 0)),
        ),
        compiler_params=pltpu.CompilerParams(
            dimension_semantics=("parallel",),
            # x tiles double-buffered: TB(2048) * F * 4 B * 2 (~6.4 MiB at F=784)
            # + ~0.2 MiB resident weights -> well under 48 MiB on every chip
            # (v7x physical VMEM is 64 MiB).
            vmem_limit_bytes=48 * 1024 * 1024,
        ),
        cost_estimate=cost,
    )(xf, w1b, b1f, w2b, b2f)

    return out


def init_params(key, in_features, h1=64, h2=16):
    """Deterministic init mimicking PyTorch nn.Linear default (U(-1/sqrt(fan_in), +))."""
    k1, k2, k3, k4 = jax.random.split(key, 4)
    lim1 = 1.0 / jnp.sqrt(in_features)
    lim2 = 1.0 / jnp.sqrt(h1)
    w1 = jax.random.uniform(k1, (in_features, h1), jnp.float32, -lim1, lim1)
    b1 = jax.random.uniform(k2, (1, h1), jnp.float32, -lim1, lim1)
    w2 = jax.random.uniform(k3, (h1, h2), jnp.float32, -lim2, lim2)
    b2 = jax.random.uniform(k4, (1, h2), jnp.float32, -lim2, lim2)
    return w1, b1, w2, b2


if __name__ == "__main__":
    # Small image_size=(16, 16) -> 256 input features; batch=8.
    image_size = (16, 16)
    B = 8
    F = image_size[0] * image_size[1]

    key = jax.random.PRNGKey(0)
    kx, kp = jax.random.split(key)
    x = jax.random.normal(kx, (B, F), jnp.float32)
    w1, b1, w2, b2 = init_params(kp, F)

    out = discriminator_forward(x, w1, b1, w2, b2)
    out = jax.block_until_ready(out)
    assert out.shape == (B, 16)

    # Reference mirroring the kernel's bf16-input / f32-accumulate math.
    xb, w1b, w2b = (t.astype(jnp.bfloat16) for t in (x, w1, w2))
    h_ref = jnp.maximum(jnp.dot(xb, w1b, preferred_element_type=jnp.float32) + b1, 0.0)
    z_ref = jnp.dot(h_ref.astype(jnp.bfloat16), w2b,
                    preferred_element_type=jnp.float32) + b2
    ref_bf16 = jax.nn.sigmoid(z_ref)
    assert jnp.allclose(out, ref_bf16, atol=1e-2), float(jnp.max(jnp.abs(out - ref_bf16)))

    # Loose sanity check against the pure-f32 PyTorch-equivalent reference.
    ref_f32 = jax.nn.sigmoid(jnp.maximum(x @ w1 + b1, 0.0) @ w2 + b2)
    assert jnp.allclose(out, ref_f32, atol=3e-2), float(jnp.max(jnp.abs(out - ref_f32)))

    print("KERNEL_OK")
</pallas_src>

<mosaic_0001>
module attributes {stable_mosaic.version = 11 : i64} {
  func.func @_disc_kernel(%arg0: i32, %arg1: memref<8x256xf32, #tpu.memory_space<vmem>>, %arg2: memref<256x64xbf16, #tpu.memory_space<vmem>>, %arg3: memref<1x64xf32, #tpu.memory_space<vmem>>, %arg4: memref<64x16xbf16, #tpu.memory_space<vmem>>, %arg5: memref<1x16xf32, #tpu.memory_space<vmem>>, %arg6: memref<8x16xf32, #tpu.memory_space<vmem>>) attributes {dimension_semantics = [#tpu.dimension_semantics<parallel>], iteration_bounds = array<i64: 1>, scalar_prefetch = 0 : i64, scratch_operands = 0 : i64, tpu.core_type = #tpu.core_type<tc>, window_params = [{transform_indices = @transform_0, window_bounds = array<i64: 8, 256>}, {pipeline_mode = #tpu.pipeline_mode<synchronous>, transform_indices = @transform_1, window_bounds = array<i64: 256, 64>}, {pipeline_mode = #tpu.pipeline_mode<synchronous>, transform_indices = @transform_2, window_bounds = array<i64: 1, 64>}, {pipeline_mode = #tpu.pipeline_mode<synchronous>, transform_indices = @transform_3, window_bounds = array<i64: 64, 16>}, {pipeline_mode = #tpu.pipeline_mode<synchronous>, transform_indices = @transform_4, window_bounds = array<i64: 1, 16>}, {transform_indices = @transform_5, window_bounds = array<i64: 8, 16>}]} {
    %c0 = arith.constant 0 : index
    %c0_0 = arith.constant 0 : index
    %0 = vector.load %arg1[%c0, %c0_0] : memref<8x256xf32, #tpu.memory_space<vmem>>, vector<8x256xf32>
    %1 = arith.truncf %0 : vector<8x256xf32> to vector<8x256xbf16>
    %c0_1 = arith.constant 0 : index
    %c0_2 = arith.constant 0 : index
    %2 = vector.load %arg2[%c0_1, %c0_2] : memref<256x64xbf16, #tpu.memory_space<vmem>>, vector<256x64xbf16>
    %cst = arith.constant dense<0.000000e+00> : vector<8x64xf32>
    %3 = tpu.matmul %1, %2, %cst {dimension_numbers = #tpu.dot_dimension_numbers<[1], [0], [0], [1], [0, 0, 1, 1], [], []>} : vector<8x256xbf16>, vector<256x64xbf16>, vector<8x64xf32> -> vector<8x64xf32>
    %c0_3 = arith.constant 0 : index
    %c0_4 = arith.constant 0 : index
    %4 = vector.load %arg3[%c0_3, %c0_4] : memref<1x64xf32, #tpu.memory_space<vmem>>, vector<1x64xf32>
    %5 = vector.broadcast %4 : vector<1x64xf32> to vector<8x64xf32>
    %6 = arith.addf %3, %5 : vector<8x64xf32>
    %cst_5 = arith.constant 0.000000e+00 : f32
    %7 = vector.broadcast %cst_5 : f32 to vector<8x64xf32>
    %8 = arith.maximumf %6, %7 : vector<8x64xf32>
    %9 = arith.truncf %8 : vector<8x64xf32> to vector<8x64xbf16>
    %c0_6 = arith.constant 0 : index
    %c0_7 = arith.constant 0 : index
    %10 = vector.load %arg4[%c0_6, %c0_7] : memref<64x16xbf16, #tpu.memory_space<vmem>>, vector<64x16xbf16>
    %cst_8 = arith.constant dense<0.000000e+00> : vector<8x16xf32>
    %11 = tpu.matmul %9, %10, %cst_8 {dimension_numbers = #tpu.dot_dimension_numbers<[1], [0], [0], [1], [0, 0, 1, 1], [], []>} : vector<8x64xbf16>, vector<64x16xbf16>, vector<8x16xf32> -> vector<8x16xf32>
    %c0_9 = arith.constant 0 : index
    %c0_10 = arith.constant 0 : index
    %12 = vector.load %arg5[%c0_9, %c0_10] : memref<1x16xf32, #tpu.memory_space<vmem>>, vector<1x16xf32>
    %13 = vector.broadcast %12 : vector<1x16xf32> to vector<8x16xf32>
    %14 = arith.addf %11, %13 : vector<8x16xf32>
    %cst_11 = arith.constant 0.000000e+00 : f32
    %15 = vector.broadcast %cst_11 : f32 to vector<8x16xf32>
    %16 = arith.subf %15, %14 : vector<8x16xf32>
    %17 = math.exp %16 : vector<8x16xf32>
    %cst_12 = arith.constant 1.000000e+00 : f32
    %18 = vector.broadcast %cst_12 : f32 to vector<8x16xf32>
    %19 = arith.addf %18, %17 : vector<8x16xf32>
    %cst_13 = arith.constant 1.000000e+00 : f32
    %20 = vector.broadcast %cst_13 : f32 to vector<8x16xf32>
    %21 = arith.divf %20, %19 : vector<8x16xf32>
    %c0_14 = arith.constant 0 : index
    %c0_15 = arith.constant 0 : index
    %22 = vector.load %arg6[%c0_14, %c0_15] : memref<8x16xf32, #tpu.memory_space<vmem>>, vector<8x16xf32>
    tpu.vector_store %arg6[%c0_14, %c0_15], %21 {strides = array<i32>} : memref<8x16xf32, #tpu.memory_space<vmem>>, vector<8x16xf32>,
    return
  }
  func.func @transform_0(%arg0: i32) -> (i32, i32) {
    %c0_i32 = arith.constant 0 : i32
    %c0_i32_0 = arith.constant 0 : i32
    return %arg0, %c0_i32 : i32, i32
  }
  func.func @transform_1(%arg0: i32) -> (i32, i32) {
    %c0_i32 = arith.constant 0 : i32
    %c0_i32_0 = arith.constant 0 : i32
    %c0_i32_1 = arith.constant 0 : i32
    return %c0_i32, %c0_i32_0 : i32, i32
  }
  func.func @transform_2(%arg0: i32) -> (i32, i32) {
    %c0_i32 = arith.constant 0 : i32
    %c0_i32_0 = arith.constant 0 : i32
    %c0_i32_1 = arith.constant 0 : i32
    return %c0_i32, %c0_i32_0 : i32, i32
  }
  func.func @transform_3(%arg0: i32) -> (i32, i32) {
    %c0_i32 = arith.constant 0 : i32
    %c0_i32_0 = arith.constant 0 : i32
    %c0_i32_1 = arith.constant 0 : i32
    return %c0_i32, %c0_i32_0 : i32, i32
  }
  func.func @transform_4(%arg0: i32) -> (i32, i32) {
    %c0_i32 = arith.constant 0 : i32
    %c0_i32_0 = arith.constant 0 : i32
    %c0_i32_1 = arith.constant 0 : i32
    return %c0_i32, %c0_i32_0 : i32, i32
  }
  func.func @transform_5(%arg0: i32) -> (i32, i32) {
    %c0_i32 = arith.constant 0 : i32
    %c0_i32_0 = arith.constant 0 : i32
    return %arg0, %c0_i32 : i32, i32
  }
}

</mosaic_0001>

<bundles_post_ra>
// kernel: tpu_custom_call.1
= control target key start
LH: loop header
LB: loop body
LE: loop exit
PB: predicated region body
PF: predicated region fallthrough
CT: control target
= control target key end

     0   :  { %v421_v2 = vmov 0.0   ;;  %s538_s0 = inlined_call_operand.vmem [shape: f32[8,256], index: 0, kind: input, shape index: {}]   ;;  %s539_s1 = inlined_call_operand.vmem [shape: bf16[256,64], index: 1, kind: input, shape index: {}]   ;;  %s540_s2 = inlined_call_operand.vmem [shape: f32[1,64], index: 2, kind: input, shape index: {}]   ;;  %s541_s3 = inlined_call_operand.vmem [shape: bf16[64,16], index: 3, kind: input, shape index: {}]   ;;  %s542_s4 = inlined_call_operand.vmem [shape: f32[1,16], index: 4, kind: input, shape index: {}]   ;;  %s543_s5 = inlined_call_operand.hbm [shape: f32[8,16], index: 5, kind: output, shape index: {}]  }
   0x1   :  { %v373_v0 = vld [vmem:[%s539_s1 + $0x40] sm:$0xff]   ;;  %358 = vmatprep.subr.bf16.mxu1 %v421_v2  ;;  %v375_v3 = vld [vmem:[%s539_s1 + $0x48] sm:$0xff]   ;;  %v377_v5 = vld [vmem:[%s539_s1 + $0x50] sm:$0xff]  }
   0x2   :  { %v374_v1 = vld [vmem:[%s539_s1] sm:$0xff]   ;;  %331 = vmatprep.subr.bf16.mxu0 %v373_v0  ;;  %v376_v4 = vld [vmem:[%s539_s1 + $0x8] sm:$0xff]   ;;  %v378_v6 = vld [vmem:[%s539_s1 + $0x10] sm:$0xff]  }
   0x3   :  { %332 = vmatpush3.bf16.msra.mxu0 %v374_v1  ;;  %v379_v7 = vld [vmem:[%s539_s1 + $0x58] sm:$0xff]   ;;  %v381_v9 = vld [vmem:[%s539_s1 + $0x60] sm:$0xff]   ;;  %v383_v11 = vld [vmem:[%s539_s1 + $0x68] sm:$0xff]  }
   0x4   :  { %333 = vmatprep.subr.bf16.mxu0 %v375_v3  ;;  %v380_v8 = vld [vmem:[%s539_s1 + $0x18] sm:$0xff]   ;;  %v382_v10 = vld [vmem:[%s539_s1 + $0x20] sm:$0xff]   ;;  %v23_v12 = vld [vmem:[%s538_s0 + $0x8] sm:$0xff] }
   0x5   :  { %v25_v13 = vpack.c.bf16 %v23_v12, %v23_v12  ;;  %v389_v14 = vld [vmem:[%s541_s3] sm:$0xff]   ;;  %v384_v15 = vld [vmem:[%s539_s1 + $0x28] sm:$0xff]   ;;  %v385_v16 = vld [vmem:[%s539_s1 + $0x70] sm:$0xff]  }
   0x6   :  { %359 = vmatpush3.bf16.msra.mxu1 %v389_v14  ;;  %v390_v17 = vld [vmem:[%s541_s3 + $0x8] sm:$0xff]  }
   0x7   :  { %334 = vmatpush3.bf16.msra.mxu0 %v376_v4  ;;  %193 = vmatprep.mubr.bf16.mxu0 %v25_v13 }
   0x8   :  { %335 = vmatprep.subr.bf16.mxu0 %v377_v5 }
   0xb   :  { %336 = vmatpush3.bf16.msra.mxu0 %v378_v6 }
   0xc   :  { %337 = vmatprep.subr.bf16.mxu0 %v379_v7 }
   0xf   :  { %338 = vmatpush3.bf16.msra.mxu0 %v380_v8 }
  0x10   :  { %339 = vmatprep.subr.bf16.mxu0 %v381_v9 }
  0x13   :  { %340 = vmatpush3.bf16.msra.mxu0 %v382_v10 }
  0x14   :  { %341 = vmatprep.subr.bf16.mxu0 %v383_v11 }
  0x15   :  { %10 = vsyncpa [#allocation3], 0  ;;  %360 = vmatprep.subr.bf16.mxu1 %v421_v2  ;;  %v386_v18 = vld [vmem:[%s539_s1 + $0x30] sm:$0xff]   ;;  %v387_v19 = vld [vmem:[%s539_s1 + $0x78] sm:$0xff]   ;;  %vm422_vm0 = vmmov 0   ;;  %vm242_vm1 = vcmask 523264  }
  0x16   :  { %361 = vmatpush3.bf16.msra.mxu1 %v390_v17  ;;  %v388_v20 = vld [vmem:[%s539_s1 + $0x38] sm:$0xff]   ;;  %v22_v21 = vld [vmem:[%s538_s0] sm:$0xff]  ;;  %v391_v23 = vld [vmem:[%s541_s3 + $0x10] sm:$0xff]   ;;  %366 = vmatprep.mubr.msk.bf16.mxu1 %vm422_vm0, %v421_v2  ;;  %vm292_vm2 = vcmask 130048  }
  0x17   :  { %342 = vmatpush3.bf16.msra.mxu0 %v384_v15  ;;  %362 = vmatprep.subr.bf16.mxu1 %v421_v2  ;;  %v24_v22 = vpack.c.bf16 %v22_v21, %v22_v21  ;;  %v392_v24 = vld [vmem:[%s541_s3 + $0x18] sm:$0xff]   ;;  %v308_v26 = vld [vmem:[%s540_s2] ss:$0 sm:$0xff]  ;;  %s423_s2 = smov [#allocation2]  }
  0x18   :  { %343 = vmatprep.subr.bf16.mxu0 %v385_v16  ;;  %v325_v34 = vld [vmem:[%s542_s4] ss:$0 sm:$0xff]  ;;  %s300_s3 = sshll.u32 %s423_s2, 4  ;;  %s301_s3 = int_to_ptr.vmem [resolvable:$true] %s300_s3 }
  0x19   :  { %s397_s14 = scalar_lea.vmem %s301_s3, 128  ;;  %p402_p1 = scmp.lt.s32.totalorder %s301_s3, %s301_s3 }
  0x1a   :  { %363 = vmatpush3.bf16.msra.mxu1 %v391_v23  ;;  %p398_p0 = scmp.ne.s32.totalorder %s301_s3, %s397_s14  ;;  %p403_p2 = scmp.lt.s32.totalorder %s397_s14, %s397_s14 }
  0x1b   :  { %344 = vmatpush3.bf16.msra.mxu0 %v386_v18  ;;  %364 = vmatprep.subr.bf16.mxu1 %v421_v2 }
  0x1c   :  { %345 = vmatprep.subr.bf16.mxu0 %v387_v19  ;;  %p404_p3 = por %p403_p2, %p402_p1 }
  0x1e   :  { %365 = vmatpush3.bf16.msra.mxu1 %v392_v24  ;;  %p405_p4 = pnand %p404_p3, %p398_p0 }
  0x1f   :  { %346 = vmatpush3.bf16.msra.mxu0 %v388_v20 }
  0x22   :  { %194 = vmatmul.mubr.bf16.vlgmr.msra.gmra.mrb[0].mxu0 %v24_v22 }
  0xf5   :  { %v347_v25 = vpop.f32.mrb[0].mxu0 }
  0xf6   :  { %v348_v27 = vpop.f32.mrb[1].mxu0 }
  0xf7   :  { %v349_v28 = vadd.f32 %v348_v27, %v347_v25  ;;  %v350_v29 = vpop.f32.mrb[2].mxu0 }
  0xf8   :  { %v351_v30 = vpop.f32.mrb[3].mxu0 }
  0xf9   :  { %v196_v31 = vadd.f32 %v349_v28, %v308_v26 }
  0xfb   :  { %v201_v32 = vmax.f32 %v196_v31, 0.0 }
  0xfd   :  { %v202_v33 = vpack.c.bf16 %v201_v32, %v201_v32 }
  0xff   :  { %367 = vmatmul.mubr.msk.bf16.vlgmr.msra.gmra.mrb[0].mxu1 %vm242_vm1, %v202_v33 }
 0x1d2   :  { %v280_v35 = vpop.f32.mrb[0].mxu1 }
 0x1d3   :  { %v281_v36 = vadd.f32 %v325_v34, %v280_v35  ;;  %v368_v37 = vpop.f32.mrb[1].mxu1 }
 0x1d4   :  { %v283_v38 = vpop.f32.mrb[2].mxu1 }
 0x1d5   :  { %v286_v39 = vsub.f32 0.0, %v281_v36  ;;  %v369_v40 = vpop.f32.mrb[3].mxu1 }
 0x1d7   :  { %v287_v41 = vmul.f32 1.442695, %v286_v39 }
 0x1d9   :  { %393 = vpow2.f32 %v287_v41 }
 0x1e3   :  { %v394_v42 = vpop.eup %393 }
 0x1e4   :  { %v289_v43 = vadd.f32 1.0, %v394_v42 }
 0x1e6   :  { %395 = vrcp.f32 %v289_v43 }
 0x1f0   :  { %v396_v44 = vpop.eup %395 }
 0x1f1   :  { %293 = vst.msk [vmem:[#allocation2] sm:$0xff] %vm292_vm2, %v396_v44 }
 0x1f2   :  { %408 = shalt.err (!%p405_p4)
}
 0x1f3   :  { %s409_s16 = scalar_lea.hbm %s543_s5, 128 }
 0x1f4   :  { %p410_p5 = scmp.ne.s32.totalorder %s543_s5, %s409_s16  ;;  %p413_p6 = scmp.lt.u32.totalorder %s409_s16, %s543_s5 }
 0x1f6   :  { %p415_p7 = pnand %p413_p6, %p410_p5 }
 0x1f8   :  { %418 = shalt.err (!%p415_p7)
}
 0x1f9   :  { %303 = dma.vmem_to_hbm [thread:$0]  %s301_s3, 128, %s543_s5, [#allocation3]  }
 0x1fa   :  { %419 = dma.done.wait [#allocation3], 128  }
 0x1fb   :  { %420 = vsyncadd [#allocation3], 4294967168 }
 0x1fc   :  { %307 = vsyncpa [#allocation3], 1 }

</bundles_post_ra>
